<compile_context>
chip_gen: v5e
topology: v5e:2x2
jax: 0.10.0
libtpu: 0.0.40
codegen_flags: <defaults>
</compile_context>

<pallas_src>
import functools

import jax
import jax.numpy as jnp
from jax.experimental import pallas as pl
from jax.experimental.pallas import tpu as pltpu

# ----------------------------- model config ---------------------------------
N_CLASSES = 4
LATENT_DIM = 32
EMBEDDING_DIM = 16
HIDDEN = 64
OUT_CHANNELS = 8
BATCH = 2
CUR_STAGE = 2          # Generator.set_stage(2) -> _stage = 1, alpha = 0
LEAKY_SLOPE = 0.2

SUBLANE = 8            # f32 sublane packing: pad batch to a multiple of this
LANE = 128             # lane width: pad output to this for a lane-dense store

FIRST_IN = HIDDEN                  # first-layer input padded to 64 lanes
HID_STRIDE = HIDDEN + SUBLANE      # per-layer rows in the packed weight slab
assert LATENT_DIM + N_CLASSES <= FIRST_IN


def _round_up(n, m):
    return (n + m - 1) // m * m


# ----------------------------- fused Pallas kernel ---------------------------
def _generator_fused_kernel(x_ref, y_ref, hid_ref, out_ref, o_ref, *, cur_stage):
    """Whole Generator.forward in a single kernel.

    x_ref   : VMEM (Bp, 64)  f32   latent, lane-padded (lanes 32..63 zero)
    y_ref   : VMEM (Bp, 1)   i32   label indices
    hid_ref : VMEM (cur_stage*72, 64) f32 packed hidden-layer slab; per layer i
              rows [i*72, i*72+64) weight, row i*72+64 bias (rest zero padding)
    out_ref : VMEM (72, 128) f32   lane-padded out-projection; row 64 = bias
    o_ref   : VMEM (Bp, 128) f32   output (lanes >= OUT_CHANNELS are zero)
    All intermediates stay in vregs; only the final (Bp,128) store hits HBM.
    """
    # Drop a one-hot for the class into lanes LATENT_DIM..LATENT_DIM+C-1 of
    # the padded latent (pure VPU: iota compare + add, no gather, no concat).
    labels = y_ref[...]                                             # (Bp, 1) i32
    lanes = jax.lax.broadcasted_iota(jnp.int32, (labels.shape[0], FIRST_IN), 1)
    onehot = (lanes == labels + LATENT_DIM).astype(jnp.float32)     # (Bp, 64)
    h = x_ref[...] + onehot                                         # (Bp, 64)

    # intermediate_sequence of every block: one MXU matmul per layer, weights
    # sliced out of the single packed slab with static (sublane-aligned) views.
    for i in range(cur_stage):
        base = i * HID_STRIDE
        w = hid_ref[base:base + HIDDEN, :]                          # (64, 64)
        b = hid_ref[base + HIDDEN:base + HIDDEN + 1, :]             # (1, 64)
        h = jnp.dot(h, w, preferred_element_type=jnp.float32) + b
        h = jnp.maximum(h, LEAKY_SLOPE * h)                         # LeakyReLU(0.2)

    # out_sequence of the last block (lane-padded -> unmasked 128-wide vst).
    wo = out_ref[0:HIDDEN, :]                                       # (64, 128)
    bo = out_ref[HIDDEN:HIDDEN + 1, :]                              # (1, 128)
    out = jnp.dot(h, wo, preferred_element_type=jnp.float32) + bo
    o_ref[...] = out.astype(o_ref.dtype)


# ----------------------------- static parameter prep -------------------------
def prepare_params(params, *, cur_stage=CUR_STAGE):
    """One-time packing of all weights into two (sublane-aligned) VMEM slabs.

    Folds the embedding table into the first Linear:
        cat([x, E[y]], 1) @ W1 == x @ W1[:L] + one_hot(y) @ (E @ W1[L:])
    so the stacked first-layer weight is [W1[:L] ; E @ W1[L:] ; 0].
    Call this ONCE (not per forward call).
    """
    blk0 = params["blocks"][0]
    w1 = blk0["w"]                                       # (LATENT+EMB, HIDDEN)
    class_w = jnp.dot(params["emb_table"], w1[LATENT_DIM:])          # (C, H)
    w1_stacked = (jnp.zeros((FIRST_IN, HIDDEN), jnp.float32)
                  .at[:LATENT_DIM].set(w1[:LATENT_DIM])
                  .at[LATENT_DIM:LATENT_DIM + N_CLASSES].set(class_w))

    hid_slab = jnp.zeros((cur_stage * HID_STRIDE, HIDDEN), jnp.float32)
    hid_slab = (hid_slab.at[0:HIDDEN].set(w1_stacked)
                        .at[HIDDEN:HIDDEN + 1].set(blk0["b"]))
    for i in range(1, cur_stage):
        blk = params["blocks"][i]
        base = i * HID_STRIDE
        hid_slab = (hid_slab.at[base:base + HIDDEN].set(blk["w"])
                            .at[base + HIDDEN:base + HIDDEN + 1].set(blk["b"]))

    blk_last = params["blocks"][cur_stage - 1]
    out_slab = jnp.zeros((HIDDEN + SUBLANE, LANE), jnp.float32)
    out_slab = (out_slab.at[:HIDDEN, :OUT_CHANNELS].set(blk_last["w_out"])
                        .at[HIDDEN:HIDDEN + 1, :OUT_CHANNELS].set(blk_last["b_out"]))

    return {"hid_slab": hid_slab, "out_slab": out_slab}


# ----------------------------- Generator.forward -----------------------------
def generator_forward(prepped, x, y, *, cur_stage=CUR_STAGE, fading=False):
    alpha = 1 if cur_stage == 1 else 0
    if fading and alpha < 1:
        # TODO(synk): fading path (previous block's out_sequence + bicubic
        # resample + alpha blend) not implemented; this config uses fading=False.
        raise NotImplementedError("fading/bicubic-resample path not implemented")

    B = x.shape[0]
    Bp = _round_up(max(B, SUBLANE), SUBLANE)

    # Only per-call data prep: pad batch to full sublanes and latent to 64
    # lanes in one shot; padded rows are sliced off after the kernel.
    xin = jnp.zeros((Bp, FIRST_IN), jnp.float32).at[:B, :LATENT_DIM].set(x)
    y_pad = jnp.zeros((Bp, 1), jnp.int32).at[:B, 0].set(y.astype(jnp.int32))

    hid_slab = prepped["hid_slab"]
    out_slab = prepped["out_slab"]

    flops = int(2 * Bp * FIRST_IN * HIDDEN
                + 2 * Bp * HIDDEN * HIDDEN * (cur_stage - 1)
                + 2 * Bp * HIDDEN * LANE)
    bytes_accessed = int(xin.size * 4 + y_pad.size * 4
                         + hid_slab.size * 4 + out_slab.size * 4
                         + Bp * LANE * 4)

    # NOTE(v7x): at BATCH=2 the kernel stays un-gridded (grid steps only add
    # ~0.35us overhead). If the batch grows (sampling loops), add a batch grid
    # with dimension_semantics=("parallel",) and >=256-row blocks so both
    # TensorCores get work; v5e/v6e (1 TC) gain nothing from that.
    out_pad = pl.pallas_call(
        functools.partial(_generator_fused_kernel, cur_stage=cur_stage),
        out_shape=jax.ShapeDtypeStruct((Bp, LANE), jnp.float32),
        in_specs=[pl.BlockSpec(memory_space=pltpu.MemorySpace.VMEM)] * 4,
        out_specs=pl.BlockSpec(memory_space=pltpu.MemorySpace.VMEM),
        cost_estimate=pl.CostEstimate(flops=flops, transcendentals=0,
                                      bytes_accessed=bytes_accessed),
    )(xin, y_pad, hid_slab, out_slab)

    # Slice away sublane / lane padding.
    return out_pad[:B, :OUT_CHANNELS]


# ----------------------------- parameters ------------------------------------
def init_params(key):
    """Parameter init matching shapes/init of the PyTorch module.

    nn.Linear weights are stored transposed as (in, out); biases use PyTorch's
    uniform(-1/sqrt(fan_in), 1/sqrt(fan_in)) init; nn.Embedding ~ N(0, 1).
    """
    keys = iter(jax.random.split(key, 1 + 4 * CUR_STAGE))

    def lin(fan_in, fan_out):
        bound = 1.0 / float(fan_in) ** 0.5
        w = jax.random.uniform(next(keys), (fan_in, fan_out), jnp.float32, -bound, bound)
        b = jax.random.uniform(next(keys), (1, fan_out), jnp.float32, -bound, bound)
        return w, b

    params = {
        "emb_table": jax.random.normal(next(keys), (N_CLASSES, EMBEDDING_DIM), jnp.float32),
        "blocks": [],
    }
    in_dims = [LATENT_DIM + EMBEDDING_DIM] + [HIDDEN] * (CUR_STAGE - 1)
    for i in range(CUR_STAGE):
        w, b = lin(in_dims[i], HIDDEN)            # intermediate_sequence
        w_out, b_out = lin(HIDDEN, OUT_CHANNELS)  # out_sequence
        params["blocks"].append({"w": w, "b": b, "w_out": w_out, "b_out": b_out})
    return params


# ----------------------------- reference (pure JAX) ---------------------------
def generator_forward_ref(params, x, y, *, cur_stage=CUR_STAGE):
    emb = params["emb_table"][y]
    h = jnp.concatenate([x, emb], axis=1)
    for i in range(cur_stage):
        blk = params["blocks"][i]
        h = h @ blk["w"] + blk["b"]
        h = jnp.where(h > 0, h, LEAKY_SLOPE * h)
        if i == cur_stage - 1:
            h = h @ blk["w_out"] + blk["b_out"]
    return h


# ----------------------------- main -------------------------------------------
if __name__ == "__main__":
    key = jax.random.PRNGKey(0)
    k_param, k_x, k_y = jax.random.split(key, 3)

    params = init_params(k_param)
    prepped = jax.tree_util.tree_map(jax.block_until_ready, prepare_params(params))

    x = jax.random.normal(k_x, (BATCH, LATENT_DIM), jnp.float32)
    y = jax.random.randint(k_y, (BATCH,), 0, N_CLASSES, jnp.int32)

    out = jax.block_until_ready(generator_forward(prepped, x, y))
    ref = generator_forward_ref(params, x, y)

    assert out.shape == (BATCH, OUT_CHANNELS), out.shape
    assert jnp.allclose(out, ref, atol=1e-4, rtol=1e-4), "mismatch vs JAX reference"

    print("KERNEL_OK")
</pallas_src>

<mosaic_0001>
module attributes {stable_mosaic.version = 11 : i64} {
  func.func @_generator_fused_kernel(%arg0: memref<8x64xf32, #tpu.memory_space<vmem>>, %arg1: memref<8x1xi32, #tpu.memory_space<vmem>>, %arg2: memref<144x64xf32, #tpu.memory_space<vmem>>, %arg3: memref<72x128xf32, #tpu.memory_space<vmem>>, %arg4: memref<8x128xf32, #tpu.memory_space<vmem>>) attributes {dimension_semantics = [], scalar_prefetch = 0 : i64, scratch_operands = 0 : i64, tpu.core_type = #tpu.core_type<tc>} {
    %c0 = arith.constant 0 : index
    %c0_0 = arith.constant 0 : index
    %0 = vector.load %arg1[%c0, %c0_0] : memref<8x1xi32, #tpu.memory_space<vmem>>, vector<8x1xi32>
    %1 = tpu.iota {dimensions = array<i32: 1>} : vector<8x64xi32>
    %c32_i32 = arith.constant 32 : i32
    %2 = vector.broadcast %c32_i32 : i32 to vector<8x1xi32>
    %3 = arith.addi %0, %2 : vector<8x1xi32>
    %4 = vector.broadcast %3 : vector<8x1xi32> to vector<8x64xi32>
    %5 = arith.cmpi eq, %1, %4 : vector<8x64xi32>
    %6 = arith.extui %5 : vector<8x64xi1> to vector<8x64xi32>
    %7 = arith.sitofp %6 : vector<8x64xi32> to vector<8x64xf32>
    %c0_1 = arith.constant 0 : index
    %c0_2 = arith.constant 0 : index
    %8 = vector.load %arg0[%c0_1, %c0_2] : memref<8x64xf32, #tpu.memory_space<vmem>>, vector<8x64xf32>
    %9 = arith.addf %8, %7 : vector<8x64xf32>
    %c0_3 = arith.constant 0 : index
    %c0_4 = arith.constant 0 : index
    %10 = vector.load %arg2[%c0_3, %c0_4] : memref<144x64xf32, #tpu.memory_space<vmem>>, vector<64x64xf32>
    %c64 = arith.constant 64 : index
    %c0_5 = arith.constant 0 : index
    %11 = vector.load %arg2[%c64, %c0_5] : memref<144x64xf32, #tpu.memory_space<vmem>>, vector<1x64xf32>
    %cst = arith.constant dense<0.000000e+00> : vector<8x64xf32>
    %12 = tpu.matmul %9, %10, %cst {dimension_numbers = #tpu.dot_dimension_numbers<[1], [0], [0], [1], [0, 0, 1, 1], [], []>} : vector<8x64xf32>, vector<64x64xf32>, vector<8x64xf32> -> vector<8x64xf32>
    %13 = vector.broadcast %11 : vector<1x64xf32> to vector<8x64xf32>
    %14 = arith.addf %12, %13 : vector<8x64xf32>
    %cst_6 = arith.constant 2.000000e-01 : f32
    %15 = vector.broadcast %cst_6 : f32 to vector<8x64xf32>
    %16 = arith.mulf %15, %14 : vector<8x64xf32>
    %17 = arith.maximumf %14, %16 : vector<8x64xf32>
    %c72 = arith.constant 72 : index
    %c0_7 = arith.constant 0 : index
    %18 = vector.load %arg2[%c72, %c0_7] : memref<144x64xf32, #tpu.memory_space<vmem>>, vector<64x64xf32>
    %c136 = arith.constant 136 : index
    %c0_8 = arith.constant 0 : index
    %19 = vector.load %arg2[%c136, %c0_8] : memref<144x64xf32, #tpu.memory_space<vmem>>, vector<1x64xf32>
    %cst_9 = arith.constant dense<0.000000e+00> : vector<8x64xf32>
    %20 = tpu.matmul %17, %18, %cst_9 {dimension_numbers = #tpu.dot_dimension_numbers<[1], [0], [0], [1], [0, 0, 1, 1], [], []>} : vector<8x64xf32>, vector<64x64xf32>, vector<8x64xf32> -> vector<8x64xf32>
    %21 = vector.broadcast %19 : vector<1x64xf32> to vector<8x64xf32>
    %22 = arith.addf %20, %21 : vector<8x64xf32>
    %cst_10 = arith.constant 2.000000e-01 : f32
    %23 = vector.broadcast %cst_10 : f32 to vector<8x64xf32>
    %24 = arith.mulf %23, %22 : vector<8x64xf32>
    %25 = arith.maximumf %22, %24 : vector<8x64xf32>
    %c0_11 = arith.constant 0 : index
    %c0_12 = arith.constant 0 : index
    %26 = vector.load %arg3[%c0_11, %c0_12] : memref<72x128xf32, #tpu.memory_space<vmem>>, vector<64x128xf32>
    %c64_13 = arith.constant 64 : index
    %c0_14 = arith.constant 0 : index
    %27 = vector.load %arg3[%c64_13, %c0_14] : memref<72x128xf32, #tpu.memory_space<vmem>>, vector<1x128xf32>
    %cst_15 = arith.constant dense<0.000000e+00> : vector<8x128xf32>
    %28 = tpu.matmul %25, %26, %cst_15 {dimension_numbers = #tpu.dot_dimension_numbers<[1], [0], [0], [1], [0, 0, 1, 1], [], []>} : vector<8x64xf32>, vector<64x128xf32>, vector<8x128xf32> -> vector<8x128xf32>
    %29 = vector.broadcast %27 : vector<1x128xf32> to vector<8x128xf32>
    %30 = arith.addf %28, %29 : vector<8x128xf32>
    %c0_16 = arith.constant 0 : index
    %c0_17 = arith.constant 0 : index
    %31 = vector.load %arg4[%c0_16, %c0_17] : memref<8x128xf32, #tpu.memory_space<vmem>>, vector<8x128xf32>
    tpu.vector_store %arg4[%c0_16, %c0_17], %30 {strides = array<i32>} : memref<8x128xf32, #tpu.memory_space<vmem>>, vector<8x128xf32>,
    return
  }
}

</mosaic_0001>

<bundles_post_ra>
// kernel: tpu_custom_call.1
= control target key start
LH: loop header
LB: loop body
LE: loop exit
PB: predicated region body
PF: predicated region fallthrough
CT: control target
= control target key end

     0   :  { %v188_v3 = vmov 0   ;;  %s309_s0 = inlined_call_operand.vmem [shape: f32[8,64], index: 0, kind: input, shape index: {}]   ;;  %s310_s1 = inlined_call_operand.vmem [shape: s32[8,1], index: 1, kind: input, shape index: {}]   ;;  %s311_s2 = inlined_call_operand.vmem [shape: f32[144,64], index: 2, kind: input, shape index: {}]   ;;  %s312_s3 = inlined_call_operand.vmem [shape: f32[72,128], index: 3, kind: input, shape index: {}]   ;;  %s313_s4 = inlined_call_operand.hbm [shape: f32[8,128], index: 4, kind: output, shape index: {}]  }
   0x1   :  { %v18_v0 = vld [vmem:[%s310_s1] sm:$0xff]  ;;  %v37_v1 = vld [vmem:[%s311_s2 + $0x38] sm:$0xff]  ;;  %v36_v2 = vld [vmem:[%s311_s2 + $0x30] sm:$0xff]  ;;  %158 = vset.pattern.permute.xlu0 %v188_v3 }
   0x2   :  { %v21_v4 = vadd.s32 32, %v18_v0  ;;  %52 = vmatpush.msra.mxu0 %v37_v1  ;;  %v35_v5 = vld [vmem:[%s311_s2 + $0x28] sm:$0xff] }
   0x4   :  { %23 = vperm.xlu0 %158, %v21_v4   ;;  %53 = vmatpush.msra.mxu0 %v36_v2 }
   0x5   :  { %9 = vsyncpa [#allocation3], 0  ;;  %v34_v6 = vld [vmem:[%s311_s2 + $0x20] sm:$0xff]  ;;  %v33_v7 = vld [vmem:[%s311_s2 + $0x18] sm:$0xff]  ;;  %v19_v15 = vlaneseq  ;;  %v189_v19 = vmov 0.0   ;;  %vm40_vm1 = vcmask 523264  }
   0x6   :  { %54 = vmatpush.msra.mxu0 %v35_v5  ;;  %v32_v8 = vld [vmem:[%s311_s2 + $0x10] sm:$0xff]  ;;  %v31_v9 = vld [vmem:[%s311_s2 + $0x8] sm:$0xff]  ;;  %v30_v10 = vld [vmem:[%s311_s2] sm:$0xff]  ;;  %s190_s18 = smov [#allocation2]   ;;  %s142_s21 = sshll.u32 %s313_s4, 4  ;;  %s143_s21 = int_to_ptr.hbm [resolvable:$true] %s142_s21 }
   0x7   :  { %v73_v11 = vld [vmem:[%s311_s2 + $0x80] sm:$0xff]  ;;  %v72_v12 = vld [vmem:[%s311_s2 + $0x78] sm:$0xff]  ;;  %v71_v13 = vld [vmem:[%s311_s2 + $0x70] sm:$0xff]  ;;  %v20_v16 = vand.u32 127, %v19_v15  ;;  %s140_s19 = sshll.u32 %s190_s18, 4  ;;  %s141_s19 = int_to_ptr.vmem [resolvable:$true] %s140_s19 }
   0x8   :  { %55 = vmatpush.msra.mxu0 %v34_v6  ;;  %87 = vmatpush.msra.mxu1 %v73_v11  ;;  %v70_v14 = vld [vmem:[%s311_s2 + $0x68] sm:$0xff]  ;;  %v28_v17 = vld [vmem:[%s309_s0] sm:$0xff]  ;;  %v68_v23 = vld [vmem:[%s311_s2 + $0x58] sm:$0xff] }
   0x9   :  { %v69_v22 = vld [vmem:[%s311_s2 + $0x60] sm:$0xff]  ;;  %v67_v24 = vld [vmem:[%s311_s2 + $0x50] sm:$0xff]  ;;  %v66_v25 = vld [vmem:[%s311_s2 + $0x48] sm:$0xff] }
   0xa   :  { %56 = vmatpush.msra.mxu0 %v33_v7  ;;  %88 = vmatpush.msra.mxu1 %v72_v12  ;;  %v108_v26 = vld [vmem:[%s312_s3 + $0x38] sm:$0xff]  ;;  %v107_v27 = vld [vmem:[%s312_s3 + $0x30] sm:$0xff]  ;;  %v106_v28 = vld [vmem:[%s312_s3 + $0x28] sm:$0xff] }
   0xb   :  { %122 = vmatpush.msra.mxu2 %v108_v26  ;;  %v105_v29 = vld [vmem:[%s312_s3 + $0x20] sm:$0xff]  ;;  %v104_v35 = vld [vmem:[%s312_s3 + $0x18] sm:$0xff]  ;;  %v103_v36 = vld [vmem:[%s312_s3 + $0x10] sm:$0xff] }
   0xc   :  { %57 = vmatpush.msra.mxu0 %v32_v8  ;;  %89 = vmatpush.msra.mxu1 %v71_v13  ;;  %v159_v30 = vld [vmem:[%s311_s2 + $0x40] ss:$0 sm:$0xff]  ;;  %v102_v37 = vld [vmem:[%s312_s3 + $0x8] sm:$0xff] }
   0xd   :  { %123 = vmatpush.msra.mxu2 %v107_v27  ;;  %v101_v38 = vld [vmem:[%s312_s3] sm:$0xff]  ;;  %v160_v39 = vld [vmem:[%s311_s2 + $0x88] ss:$0 sm:$0xff] }
   0xe   :  { %58 = vmatpush.msra.mxu0 %v31_v9  ;;  %90 = vmatpush.msra.mxu1 %v70_v14  ;;  %v161_v44 = vld [vmem:[%s312_s3 + $0x40] ss:$0 sm:$0xff] }
   0xf   :  { %124 = vmatpush.msra.mxu2 %v106_v28 }
  0x10   :  { %59 = vmatpush.msra.mxu0 %v30_v10  ;;  %91 = vmatpush.msra.mxu1 %v69_v22 }
  0x11   :  { %125 = vmatpush.msra.mxu2 %v105_v29 }
  0x12   :  { %92 = vmatpush.msra.mxu1 %v68_v23 }
  0x13   :  { %126 = vmatpush.msra.mxu2 %v104_v35 }
  0x14   :  { %93 = vmatpush.msra.mxu1 %v67_v24 }
  0x15   :  { %127 = vmatpush.msra.mxu2 %v103_v36 }
  0x16   :  { %94 = vmatpush.msra.mxu1 %v66_v25 }
  0x17   :  { %128 = vmatpush.msra.mxu2 %v102_v37 }
  0x19   :  { %129 = vmatpush.msra.mxu2 %v101_v38 }
  0x76   :  { %v24_v18 = vpop.permute.xlu0 %23 }
  0x77   :  { %vm25_vm0 = vcmp.eq.s32.totalorder %v20_v16, %v24_v18 }
  0x78   :  { %v151_v20 = vsel %vm25_vm0, 1.0, %v189_v19 }
  0x79   :  { %v29_v21 = vadd.f32 %v151_v20, %v28_v17 }
  0x7b   :  { %152 = vmatmul.msk.f32.vlgmr.msra.gmra.mxu0 %vm40_vm1, %v29_v21 }
  0xf8   :  { %v61_v31 = vpop.f32.mrf.mxu0 }
  0xf9   :  { %v62_v32 = vadd.f32 %v159_v30, %v61_v31 }
  0xfb   :  { %v64_v33 = vmul.f32 0.2, %v62_v32 }
  0xfd   :  { %v65_v34 = vmax.f32 %v62_v32, %v64_v33 }
  0xff   :  { %153 = vmatmul.msk.f32.vlgmr.msra.gmra.mxu1 %vm40_vm1, %v65_v34 }
 0x17c   :  { %v96_v40 = vpop.f32.mrf.mxu1 }
 0x17d   :  { %v97_v41 = vadd.f32 %v160_v39, %v96_v40 }
 0x17f   :  { %v99_v42 = vmul.f32 0.2, %v97_v41 }
 0x181   :  { %v100_v43 = vmax.f32 %v97_v41, %v99_v42 }
 0x183   :  { %154 = vmatmul.msk.f32.vlgmr.msra.gmra.mxu2 %vm40_vm1, %v100_v43 }
 0x206   :  { %v131_v45 = vpop.f32.mrf.mxu2 }
 0x207   :  { %v132_v46 = vadd.f32 %v161_v44, %v131_v45 }
 0x209   :  { %134 = vst [vmem:[#allocation2] sm:$0xff] %v132_v46 }
 0x20a   :  { %145 = dma.vmem_to_hbm [thread:$0]  %s141_s19, 128, %s143_s21, [#allocation3]  }
 0x20b   :  { %186 = dma.done.wait [#allocation3], 128  }
 0x20c   :  { %187 = vsyncadd [#allocation3], 4294967168 }
 0x20d   :  { %150 = vsyncpa [#allocation3], 1 }

</bundles_post_ra>
